<compile_context>
chip_gen: v6e
topology: v6e:2x2x1
jax: 0.10.0
libtpu: 0.0.40
codegen_flags: <defaults>
</compile_context>

<pallas_src>
import jax
import jax.numpy as jnp
from jax.experimental import pallas as pl
from jax.experimental.pallas import tpu as pltpu

_IN = 48        # input features  (fixed by the module)
_HID = 36       # hidden features (fixed by the module)
_HP = 128       # hidden dim padded to a full lane width
_SUB = 8        # sublane quantum
_MAX_TB = 1024  # max batch-tile rows


def _mlp_kernel(x_ref, w1_ref, b1_ref, w2_ref, b2_ref, o_ref):
    # One batch tile: fused matmul -> bias -> ReLU -> matmul -> bias.
    x = x_ref[...]                                                     # (TB, 48)
    h = jnp.dot(x, w1_ref[...], preferred_element_type=jnp.float32)    # (TB, 128)
    h = jnp.maximum(h + b1_ref[...], 0.0)                              # lane-dense
    o = jnp.dot(h, w2_ref[...], preferred_element_type=jnp.float32)    # (TB, L)
    o_ref[...] = (o + b2_ref[...]).astype(o_ref.dtype)


def _round_up(n, m):
    return ((n + m - 1) // m) * m


def classifier_forward(x, w1, b1, w2, b2):
    """Forward pass of Classifier.

    x:  any shape whose total size is divisible by 48 (PyTorch view(-1, 48))
    w1: (48, 36)   b1: (36,) or (1, 36)
    w2: (36, L)    b2: (L,)  or (1, L)
    returns: (B, L) float32, B = x.size // 48
    """
    x2d = x.reshape(-1, _IN)
    if x2d.dtype != jnp.float32:
        x2d = x2d.astype(jnp.float32)
    B = x2d.shape[0]
    L = w2.shape[1]

    # ---- trace-time weight prep (tiny arrays, padded once) -------------------
    w1 = w1.astype(jnp.float32)
    w2 = w2.astype(jnp.float32)
    b1 = b1.reshape(1, _HID).astype(jnp.float32)
    b2 = b2.reshape(1, L).astype(jnp.float32)

    w1p = jnp.zeros((_IN, _HP), jnp.float32).at[:, :_HID].set(w1)   # (48, 128)
    b1p = jnp.zeros((1, _HP), jnp.float32).at[:, :_HID].set(b1)     # (1, 128)
    w2p = jnp.zeros((_HP, L), jnp.float32).at[:_HID, :].set(w2)     # (128, L)

    # ---- batch tiling ---------------------------------------------------------
    TB = min(_MAX_TB, _round_up(B, _SUB))
    B_pad = _round_up(B, TB)
    if B_pad != B:
        x2d = jnp.pad(x2d, ((0, B_pad - B), (0, 0)))
    n_tiles = B_pad // TB

    grid_spec = pltpu.PrefetchScalarGridSpec(
        num_scalar_prefetch=0,
        grid=(n_tiles,),
        in_specs=[
            pl.BlockSpec((TB, _IN), lambda i: (i, 0)),    # x tile walks the batch
            pl.BlockSpec((_IN, _HP), lambda i: (0, 0)),   # weights stay resident
            pl.BlockSpec((1, _HP), lambda i: (0, 0)),
            pl.BlockSpec((_HP, L), lambda i: (0, 0)),
            pl.BlockSpec((1, L), lambda i: (0, 0)),
        ],
        out_specs=pl.BlockSpec((TB, L), lambda i: (i, 0)),  # full last dim -> contiguous DMA
    )

    flops = 2 * B_pad * (_IN * _HP + _HP * L)
    bytes_accessed = 4 * (
        B_pad * _IN + B_pad * L + _IN * _HP + _HP + _HP * L + L
    )
    cost = pl.CostEstimate(
        flops=flops, transcendentals=0, bytes_accessed=bytes_accessed
    )

    out_padded = pl.pallas_call(
        _mlp_kernel,
        out_shape=jax.ShapeDtypeStruct((B_pad, L), jnp.float32),
        grid_spec=grid_spec,
        compiler_params=pltpu.CompilerParams(
            dimension_semantics=("parallel",),
        ),
        cost_estimate=cost,
    )(x2d, w1p, b1p, w2p, b2)

    if B_pad != B:
        return out_padded[:B, :]
    return out_padded


def init_params(key, n_labels):
    """Deterministic synthetic init matching nn.Linear shapes (uniform +/- 1/sqrt(fan_in))."""
    k1, k2, k3, k4 = jax.random.split(key, 4)
    bound1 = 1.0 / jnp.sqrt(48.0)
    bound2 = 1.0 / jnp.sqrt(36.0)
    w1 = jax.random.uniform(k1, (48, 36), jnp.float32, -bound1, bound1)
    b1 = jax.random.uniform(k2, (1, 36), jnp.float32, -bound1, bound1)
    w2 = jax.random.uniform(k3, (36, n_labels), jnp.float32, -bound2, bound2)
    b2 = jax.random.uniform(k4, (1, n_labels), jnp.float32, -bound2, bound2)
    return w1, b1, w2, b2


if __name__ == "__main__":
    n_labels = 10
    key = jax.random.PRNGKey(0)
    kx, kp = jax.random.split(key)

    # Input: batch=8, 48 features (matches x.view(-1, 48) in the PyTorch forward).
    x = jax.random.normal(kx, (8, 48), dtype=jnp.float32)
    w1, b1, w2, b2 = init_params(kp, n_labels)

    out = classifier_forward(x, w1, b1, w2, b2)
    jax.block_until_ready(out)

    # Reference check against plain JAX.
    ref = jnp.maximum(x @ w1 + b1, 0.0) @ w2 + b2
    assert out.shape == (8, n_labels)
    assert jnp.allclose(out, ref, atol=1e-5, rtol=1e-5)

    # Also exercise a batch that is not a multiple of the tile / sublane size.
    x_big = jax.random.normal(kx, (1000, 48), dtype=jnp.float32)
    out_big = classifier_forward(x_big, w1, b1, w2, b2)
    jax.block_until_ready(out_big)
    ref_big = jnp.maximum(x_big @ w1 + b1, 0.0) @ w2 + b2
    assert out_big.shape == (1000, n_labels)
    assert jnp.allclose(out_big, ref_big, atol=1e-5, rtol=1e-5)

    print("KERNEL_OK")
</pallas_src>

<mosaic_0001>
module attributes {stable_mosaic.version = 11 : i64} {
  func.func @_mlp_kernel(%arg0: i32, %arg1: memref<8x48xf32, #tpu.memory_space<vmem>>, %arg2: memref<48x128xf32, #tpu.memory_space<vmem>>, %arg3: memref<1x128xf32, #tpu.memory_space<vmem>>, %arg4: memref<128x10xf32, #tpu.memory_space<vmem>>, %arg5: memref<1x10xf32, #tpu.memory_space<vmem>>, %arg6: memref<8x10xf32, #tpu.memory_space<vmem>>) attributes {dimension_semantics = [#tpu.dimension_semantics<parallel>], iteration_bounds = array<i64: 1>, scalar_prefetch = 0 : i64, scratch_operands = 0 : i64, tpu.core_type = #tpu.core_type<tc>, window_params = [{transform_indices = @transform_0, window_bounds = array<i64: 8, 48>}, {pipeline_mode = #tpu.pipeline_mode<synchronous>, transform_indices = @transform_1, window_bounds = array<i64: 48, 128>}, {pipeline_mode = #tpu.pipeline_mode<synchronous>, transform_indices = @transform_2, window_bounds = array<i64: 1, 128>}, {pipeline_mode = #tpu.pipeline_mode<synchronous>, transform_indices = @transform_3, window_bounds = array<i64: 128, 10>}, {pipeline_mode = #tpu.pipeline_mode<synchronous>, transform_indices = @transform_4, window_bounds = array<i64: 1, 10>}, {transform_indices = @transform_5, window_bounds = array<i64: 8, 10>}]} {
    %c0 = arith.constant 0 : index
    %c0_0 = arith.constant 0 : index
    %0 = vector.load %arg1[%c0, %c0_0] : memref<8x48xf32, #tpu.memory_space<vmem>>, vector<8x48xf32>
    %c0_1 = arith.constant 0 : index
    %c0_2 = arith.constant 0 : index
    %1 = vector.load %arg2[%c0_1, %c0_2] : memref<48x128xf32, #tpu.memory_space<vmem>>, vector<48x128xf32>
    %cst = arith.constant dense<0.000000e+00> : vector<8x128xf32>
    %2 = tpu.matmul %0, %1, %cst {dimension_numbers = #tpu.dot_dimension_numbers<[1], [0], [0], [1], [0, 0, 1, 1], [], []>} : vector<8x48xf32>, vector<48x128xf32>, vector<8x128xf32> -> vector<8x128xf32>
    %c0_3 = arith.constant 0 : index
    %c0_4 = arith.constant 0 : index
    %3 = vector.load %arg3[%c0_3, %c0_4] : memref<1x128xf32, #tpu.memory_space<vmem>>, vector<1x128xf32>
    %4 = vector.broadcast %3 : vector<1x128xf32> to vector<8x128xf32>
    %5 = arith.addf %2, %4 : vector<8x128xf32>
    %cst_5 = arith.constant 0.000000e+00 : f32
    %6 = vector.broadcast %cst_5 : f32 to vector<8x128xf32>
    %7 = arith.maximumf %5, %6 : vector<8x128xf32>
    %c0_6 = arith.constant 0 : index
    %c0_7 = arith.constant 0 : index
    %8 = vector.load %arg4[%c0_6, %c0_7] : memref<128x10xf32, #tpu.memory_space<vmem>>, vector<128x10xf32>
    %cst_8 = arith.constant dense<0.000000e+00> : vector<8x10xf32>
    %9 = tpu.matmul %7, %8, %cst_8 {dimension_numbers = #tpu.dot_dimension_numbers<[1], [0], [0], [1], [0, 0, 1, 1], [], []>} : vector<8x128xf32>, vector<128x10xf32>, vector<8x10xf32> -> vector<8x10xf32>
    %c0_9 = arith.constant 0 : index
    %c0_10 = arith.constant 0 : index
    %10 = vector.load %arg5[%c0_9, %c0_10] : memref<1x10xf32, #tpu.memory_space<vmem>>, vector<1x10xf32>
    %11 = vector.broadcast %10 : vector<1x10xf32> to vector<8x10xf32>
    %12 = arith.addf %9, %11 : vector<8x10xf32>
    %c0_11 = arith.constant 0 : index
    %c0_12 = arith.constant 0 : index
    %13 = vector.load %arg6[%c0_11, %c0_12] : memref<8x10xf32, #tpu.memory_space<vmem>>, vector<8x10xf32>
    tpu.vector_store %arg6[%c0_11, %c0_12], %12 {strides = array<i32>} : memref<8x10xf32, #tpu.memory_space<vmem>>, vector<8x10xf32>,
    return
  }
  func.func @transform_0(%arg0: i32) -> (i32, i32) {
    %c0_i32 = arith.constant 0 : i32
    %c0_i32_0 = arith.constant 0 : i32
    return %arg0, %c0_i32 : i32, i32
  }
  func.func @transform_1(%arg0: i32) -> (i32, i32) {
    %c0_i32 = arith.constant 0 : i32
    %c0_i32_0 = arith.constant 0 : i32
    %c0_i32_1 = arith.constant 0 : i32
    return %c0_i32, %c0_i32_0 : i32, i32
  }
  func.func @transform_2(%arg0: i32) -> (i32, i32) {
    %c0_i32 = arith.constant 0 : i32
    %c0_i32_0 = arith.constant 0 : i32
    %c0_i32_1 = arith.constant 0 : i32
    return %c0_i32, %c0_i32_0 : i32, i32
  }
  func.func @transform_3(%arg0: i32) -> (i32, i32) {
    %c0_i32 = arith.constant 0 : i32
    %c0_i32_0 = arith.constant 0 : i32
    %c0_i32_1 = arith.constant 0 : i32
    return %c0_i32, %c0_i32_0 : i32, i32
  }
  func.func @transform_4(%arg0: i32) -> (i32, i32) {
    %c0_i32 = arith.constant 0 : i32
    %c0_i32_0 = arith.constant 0 : i32
    %c0_i32_1 = arith.constant 0 : i32
    return %c0_i32, %c0_i32_0 : i32, i32
  }
  func.func @transform_5(%arg0: i32) -> (i32, i32) {
    %c0_i32 = arith.constant 0 : i32
    %c0_i32_0 = arith.constant 0 : i32
    return %arg0, %c0_i32 : i32, i32
  }
}

</mosaic_0001>

<bundles_post_ra>
// kernel: tpu_custom_call.1
= control target key start
LH: loop header
LB: loop body
LE: loop exit
PB: predicated region body
PF: predicated region fallthrough
CT: control target
= control target key end

     0   :  { %v321_v1 = vmov 0.0   ;;  %vm322_vm0 = vmmov 0   ;;  %s458_s0 = inlined_call_operand.vmem [shape: f32[8,48], index: 0, kind: input, shape index: {}]   ;;  %s459_s1 = inlined_call_operand.vmem [shape: f32[48,128], index: 1, kind: input, shape index: {}]   ;;  %s460_s2 = inlined_call_operand.vmem [shape: f32[1,128], index: 2, kind: input, shape index: {}]   ;;  %s461_s3 = inlined_call_operand.vmem [shape: f32[128,10], index: 3, kind: input, shape index: {}]   ;;  %s462_s4 = inlined_call_operand.vmem [shape: f32[1,10], index: 4, kind: input, shape index: {}]   ;;  %s463_s5 = inlined_call_operand.hbm [shape: f32[8,10], index: 5, kind: output, shape index: {}]  }
   0x1   :  { %v27_v0 = vld [vmem:[%s459_s1 + $0x28] sm:$0xff]  ;;  %246 = vmatprep.subr.mxu0 %v321_v1  ;;  %v26_v2 = vld [vmem:[%s459_s1 + $0x20] sm:$0xff]  ;;  %258 = vmatprep.mubr.msk.f32.mxu0 %vm322_vm0, %v321_v1  ;;  %v125_v3 = vld [vmem:[%s461_s3 + $0x78] sm:$0xff] }
   0x2   :  { %247 = vmatpush3.msra.mxu0 %v27_v0  ;;  %261 = vmatprep.subr.mxu1 %v321_v1  ;;  %v124_v4 = vld [vmem:[%s461_s3 + $0x70] sm:$0xff]  ;;  %v25_v5 = vld [vmem:[%s459_s1 + $0x18] sm:$0xff]  ;;  %v123_v6 = vld [vmem:[%s461_s3 + $0x68] sm:$0xff] }
   0x3   :  { %248 = vmatprep.subr.mxu0 %v321_v1  ;;  %262 = vmatpush3.msra.mxu1 %v125_v3  ;;  %v24_v7 = vld [vmem:[%s459_s1 + $0x10] sm:$0xff]  ;;  %v122_v8 = vld [vmem:[%s461_s3 + $0x60] sm:$0xff]  ;;  %v23_v9 = vld [vmem:[%s459_s1 + $0x8] sm:$0xff] }
   0x4   :  { %249 = vmatpush3.msra.mxu0 %v26_v2  ;;  %263 = vmatprep.subr.mxu1 %v321_v1 }
   0x5   :  { %250 = vmatprep.subr.mxu0 %v321_v1  ;;  %264 = vmatpush3.msra.mxu1 %v124_v4 }
   0x6   :  { %251 = vmatpush3.msra.mxu0 %v25_v5  ;;  %265 = vmatprep.subr.mxu1 %v321_v1 }
   0x7   :  { %252 = vmatprep.subr.mxu0 %v321_v1  ;;  %266 = vmatpush3.msra.mxu1 %v123_v6 }
   0x8   :  { %10 = vsyncpa [#allocation3], 0  ;;  %253 = vmatpush3.msra.mxu0 %v24_v7  ;;  %267 = vmatprep.subr.mxu1 %v321_v1  ;;  %v121_v10 = vld [vmem:[%s461_s3 + $0x58] sm:$0xff]  ;;  %v22_v11 = vld [vmem:[%s459_s1] sm:$0xff]  ;;  %vm35_vm1 = vcmask 392192   ;;  %s323_s16 = smov [#allocation2]  }
   0x9   :  { %254 = vmatprep.subr.mxu0 %v321_v1  ;;  %268 = vmatpush3.msra.mxu1 %v122_v8  ;;  %v21_v12 = vld [vmem:[%s458_s0] sm:$0xff]  ;;  %v120_v13 = vld [vmem:[%s461_s3 + $0x50] sm:$0xff]  ;;  %v119_v14 = vld [vmem:[%s461_s3 + $0x48] sm:$0xff]  ;;  %s211_s17 = sshll.u32 %s323_s16, 4  ;;  %vm203_vm2 = vcmask 80896   ;;  %s212_s17 = int_to_ptr.vmem [resolvable:$true] %s211_s17 }
   0xa   :  { %255 = vmatpush3.msra.mxu0 %v23_v9  ;;  %269 = vmatprep.subr.mxu1 %v321_v1  ;;  %v118_v15 = vld [vmem:[%s461_s3 + $0x40] sm:$0xff]  ;;  %v117_v16 = vld [vmem:[%s461_s3 + $0x38] sm:$0xff]  ;;  %v116_v17 = vld [vmem:[%s461_s3 + $0x30] sm:$0xff]  ;;  %p304_p1 = scmp.lt.s32.totalorder %s212_s17, %s212_s17 }
   0xb   :  { %256 = vmatprep.subr.mxu0 %v321_v1  ;;  %270 = vmatpush3.msra.mxu1 %v121_v10  ;;  %v115_v18 = vld [vmem:[%s461_s3 + $0x28] sm:$0xff]  ;;  %v114_v19 = vld [vmem:[%s461_s3 + $0x20] sm:$0xff]  ;;  %v113_v20 = vld [vmem:[%s461_s3 + $0x18] sm:$0xff] }
   0xc   :  { %257 = vmatpush3.msra.mxu0 %v22_v11  ;;  %271 = vmatprep.subr.mxu1 %v321_v1  ;;  %v112_v21 = vld [vmem:[%s461_s3 + $0x10] sm:$0xff]  ;;  %v111_v22 = vld [vmem:[%s461_s3 + $0x8] sm:$0xff]  ;;  %v110_v23 = vld [vmem:[%s461_s3] sm:$0xff]  ;;  %s299_s3 = scalar_lea.vmem %s212_s17, 128 }
   0xd   :  { %259 = vmatmul.mubr.msk.f32.vlgmr.msra.gmra.mxu0 %vm35_vm1, %v21_v12  ;;  %272 = vmatpush3.msra.mxu1 %v120_v13  ;;  %v219_v24 = vld [vmem:[%s460_s2] ss:$0 sm:$0xff]  ;;  %p300_p0 = scmp.ne.s32.totalorder %s212_s17, %s299_s3  ;;  %p305_p2 = scmp.lt.s32.totalorder %s299_s3, %s299_s3 }
   0xe   :  { %273 = vmatprep.subr.mxu1 %v321_v1  ;;  %293 = vmatprep.mubr.msk.f32.mxu1 %vm322_vm0, %v321_v1  ;;  %v221_v29 = vld [vmem:[%s462_s4] ss:$0 sm:$0xff] }
   0xf   :  { %274 = vmatpush3.msra.mxu1 %v119_v14  ;;  %p306_p3 = por %p305_p2, %p304_p1 }
  0x10   :  { %275 = vmatprep.subr.mxu1 %v321_v1 }
  0x11   :  { %276 = vmatpush3.msra.mxu1 %v118_v15  ;;  %p307_p4 = pnand %p306_p3, %p300_p0 }
  0x12   :  { %277 = vmatprep.subr.mxu1 %v321_v1 }
  0x13   :  { %278 = vmatpush3.msra.mxu1 %v117_v16 }
  0x14   :  { %279 = vmatprep.subr.mxu1 %v321_v1 }
  0x15   :  { %280 = vmatpush3.msra.mxu1 %v116_v17 }
  0x16   :  { %281 = vmatprep.subr.mxu1 %v321_v1 }
  0x17   :  { %282 = vmatpush3.msra.mxu1 %v115_v18 }
  0x18   :  { %283 = vmatprep.subr.mxu1 %v321_v1 }
  0x19   :  { %284 = vmatpush3.msra.mxu1 %v114_v19 }
  0x1a   :  { %285 = vmatprep.subr.mxu1 %v321_v1 }
  0x1b   :  { %286 = vmatpush3.msra.mxu1 %v113_v20 }
  0x1c   :  { %287 = vmatprep.subr.mxu1 %v321_v1 }
  0x1d   :  { %288 = vmatpush3.msra.mxu1 %v112_v21 }
  0x1e   :  { %289 = vmatprep.subr.mxu1 %v321_v1 }
  0x1f   :  { %290 = vmatpush3.msra.mxu1 %v111_v22 }
  0x20   :  { %291 = vmatprep.subr.mxu1 %v321_v1 }
  0x21   :  { %292 = vmatpush3.msra.mxu1 %v110_v23 }
  0xcd   :  { %v105_v25 = vpop.f32.mrf.mxu0 }
  0xce   :  { %v106_v26 = vadd.f32 %v219_v24, %v105_v25 }
  0xcf   :  { %v260_v27 = vpop.f32.mrf.mxu0 }
  0xd0   :  { %v109_v28 = vmax.f32 %v106_v26, 0.0 }
  0xd2   :  { %294 = vmatmul.mubr.f32.vlgmr.msra.gmra.mxu1 %v109_v28 }
 0x192   :  { %v199_v30 = vpop.f32.mrf.mxu1 }
 0x193   :  { %v200_v31 = vadd.f32 %v221_v29, %v199_v30 }
 0x194   :  { %v295_v32 = vpop.f32.mrf.mxu1 }
 0x195   :  { %204 = vst.msk [vmem:[#allocation2] sm:$0xff] %vm203_vm2, %v200_v31 }
 0x196   :  { %310 = shalt.err (!%p307_p4)
}
 0x197   :  { %214 = dma.vmem_to_hbm [thread:$0]  %s212_s17, 128, %s463_s5, [#allocation3]  }
 0x198   :  { %319 = dma.done.wait [#allocation3], 128  }
 0x199   :  { %320 = vsyncadd [#allocation3], 4294967168 }
 0x19a   :  { %218 = vsyncpa [#allocation3], 1 }

</bundles_post_ra>
